<compile_context>
chip_gen: v5e
topology: v5e:2x2
jax: 0.10.0
libtpu: 0.0.40
codegen_flags: <defaults>
</compile_context>

<pallas_src>
import functools

import jax
import jax.numpy as jnp
from jax import lax
from jax.experimental import pallas as pl
from jax.experimental.pallas import tpu as pltpu


def _round_up(x, n):
    return ((x + n - 1) // n) * n


def _supcon_kernel(lhs_ref, rhs_ref, out_ref, sneg_ref, pos_ref, *,
                   batch_size, nearby_size, n_col_aa, n_col_total,
                   tile_rows, tile_cols, inv_temp, eps, threshold):
    B = batch_size
    m = nearby_size
    M2 = 2 * B
    N = m * B
    i = pl.program_id(0)   # row tile of za (parallel)
    j = pl.program_id(1)   # column tile over [aug-aug cols | aug-nearby cols] (reduction)

    # Reset the per-row-tile accumulators at the start of every column sweep.
    @pl.when(j == 0)
    def _init():
        sneg_ref[...] = jnp.zeros_like(sneg_ref)
        pos_ref[...] = jnp.zeros_like(pos_ref)

    # Tile-local index vectors only (no (2B,2B)/(2B,mB) int temporaries).
    row_g = i * tile_rows + lax.broadcasted_iota(jnp.int32, (tile_rows, 1), 0)  # (TQ, 1)
    col_l = lax.broadcasted_iota(jnp.int32, (1, tile_cols), 1)                  # (1, TC)

    # One unconditional MXU matmul per step against the concatenated RHS column tile.
    s = jnp.dot(lhs_ref[...], rhs_ref[...],
                preferred_element_type=jnp.float32)                             # (TQ, TC)

    # ---------------- aug-aug column tiles: sum_neg and the aug positive -------------
    @pl.when(j < n_col_aa)
    def _aa():
        col_g = j * tile_cols + col_l
        valid = col_g < M2                                       # drop padded aa columns
        off_diag = col_g != row_g                                # drop the self term
        e = jnp.exp(s * inv_temp)                                # only exp in the kernel
        sneg_ref[...] += jnp.sum(
            jnp.where(jnp.logical_and(valid, off_diag), e, 0.0),
            axis=1, keepdims=True)
        # positive column of row r is (r + B) mod 2B  (branchless, no integer modulo)
        pos_col = jnp.where(row_g < B, row_g + B, row_g - B)     # (TQ, 1)
        pos_ref[...] += float(m) * jnp.sum(
            jnp.where(col_g == pos_col, s, 0.0), axis=1, keepdims=True)

    # ---------------- aug-nearby column tiles: clamped nearby positives --------------
    @pl.when(j >= n_col_aa)
    def _an():
        sc = jnp.minimum(s, threshold)
        col_g = (j - n_col_aa) * tile_cols + col_l
        valid = col_g < N                                        # drop padded an columns
        row_mod = jnp.where(row_g < B, row_g, row_g - B)         # r % B for real rows
        near = jnp.logical_and(valid, (col_g % B) == row_mod)    # modulo on (1,TC) only
        pos_ref[...] += jnp.sum(jnp.where(near, sc, 0.0), axis=1, keepdims=True)

    # ---------------- finalize: one log per row, fold positives linearly -------------
    @pl.when(j == n_col_total - 1)
    def _fin():
        valid_row = row_g < M2                                   # drop padded rows
        logs = jnp.log(sneg_ref[...] + eps)                      # (TQ, 1)
        row_term = (2.0 * m) * logs - inv_temp * pos_ref[...]    # (TQ, 1)
        total = jnp.sum(jnp.where(valid_row, row_term, 0.0))
        out_ref[...] = jnp.full((8, 128), total * (1.0 / (4.0 * m * B)),
                                dtype=jnp.float32)


def modified_supcon_loss(z1, z2, zn, *, temperature=0.07, eps=1e-6, threshold=1.0,
                         tile_rows=256, tile_cols=512, use_bf16=True):
    """Pallas-TPU ModifiedSupCon forward. Returns the scalar loss."""
    B, D = z1.shape
    m = zn.shape[0] // B
    M2 = 2 * B
    N = m * B

    # --- host-side prep: O((2B+mB)*D) flops, tiny next to the O(B^2*D) kernel work ---
    za = jnp.concatenate([z1, z2], axis=0).astype(jnp.float32)   # (2B, D)
    znf = zn.astype(jnp.float32)

    def _normalize(x):  # cosine-style clamp (norm floored at 1e-8), rsqrt form
        ss = jnp.sum(x * x, axis=-1, keepdims=True)
        return x * lax.rsqrt(jnp.maximum(ss, 1e-16))

    op_dtype = jnp.bfloat16 if use_bf16 else jnp.float32
    za_n = _normalize(za).astype(op_dtype)
    zn_n = _normalize(znf).astype(op_dtype)

    # --- lane/MXU friendly padding; padded rows/cols are masked inside the kernel ----
    TQ = min(tile_rows, _round_up(M2, 16))            # row tile (>=16 for bf16 packing)
    TC = min(tile_cols, _round_up(max(M2, N), 128))   # column tile (multiple of 128)
    D_pad = _round_up(D, 128)
    R_rows = _round_up(M2, TQ)                        # LHS rows
    R_cols = _round_up(M2, TC)                        # aug-aug RHS columns (tile-aligned)
    N_cols = _round_up(N, TC)                         # aug-nearby RHS columns (tile-aligned)
    C_total = R_cols + N_cols

    lhs = jnp.zeros((R_rows, D_pad), op_dtype).at[:M2, :D].set(za_n)
    # Single concatenated RHS in (K, N) layout: [aug-aug | aug-nearby]; the region
    # boundary sits on a tile boundary so every column tile is purely one kind.
    rhs = (jnp.zeros((D_pad, C_total), op_dtype)
           .at[:D, :M2].set(za_n.T)
           .at[:D, R_cols:R_cols + N].set(zn_n.T))

    n_row = R_rows // TQ
    n_col_aa = R_cols // TC
    n_col_an = N_cols // TC
    n_col_total = n_col_aa + n_col_an

    kernel = functools.partial(
        _supcon_kernel,
        batch_size=B, nearby_size=m,
        n_col_aa=n_col_aa, n_col_total=n_col_total,
        tile_rows=TQ, tile_cols=TC,
        inv_temp=float(1.0 / temperature), eps=float(eps), threshold=float(threshold),
    )

    partials = pl.pallas_call(
        kernel,
        grid=(n_row, n_col_total),
        in_specs=[
            # za row tile: constant across the column sweep (fetched once per row tile)
            pl.BlockSpec((TQ, D_pad), lambda i, j: (i, 0)),
            # concatenated RHS column tile: plain sweep over the reduction axis
            pl.BlockSpec((D_pad, TC), lambda i, j: (0, j)),
        ],
        out_specs=pl.BlockSpec((8, 128), lambda i, j: (i, 0)),
        out_shape=jax.ShapeDtypeStruct((8 * n_row, 128), jnp.float32),
        scratch_shapes=[
            pltpu.VMEM((TQ, 1), jnp.float32),   # per-row sum of exp(s_aa/T) off-diagonal
            pltpu.VMEM((TQ, 1), jnp.float32),   # per-row m*s_aa_pos + masked s_an sum
        ],
        compiler_params=pltpu.CompilerParams(
            dimension_semantics=("parallel", "arbitrary")),
    )(lhs, rhs)

    # Each row tile wrote its (already scaled) partial, replicated over an (8,128) block.
    return jnp.sum(partials[::8, 0])


def _reference_loss(z1, z2, zn, *, temperature=0.07, eps=1e-6, threshold=1.0,
                    operand_dtype=None):
    """Literal re-implementation of the PyTorch forward (pure JAX), for checking."""
    B = z1.shape[0]
    m = zn.shape[0] // B
    za = jnp.concatenate([z1, z2], 0).astype(jnp.float32)
    znf = zn.astype(jnp.float32)

    def _norm(x):
        n = jnp.sqrt(jnp.sum(x * x, -1, keepdims=True))
        return x / jnp.maximum(n, 1e-8)

    zan, znn = _norm(za), _norm(znf)
    if operand_dtype is not None:   # mimic the kernel's MXU operand precision
        zan = zan.astype(operand_dtype).astype(jnp.float32)
        znn = znn.astype(operand_dtype).astype(jnp.float32)
    hi = lax.Precision.HIGHEST
    s_aa = jnp.matmul(zan, zan.T, precision=hi)
    s_an = jnp.minimum(jnp.matmul(zan, znn.T, precision=hi), threshold)
    l_aa = jnp.exp(s_aa / temperature)
    l_an = jnp.exp(s_an / temperature)
    M2 = 2 * B
    eye = jnp.eye(M2, dtype=bool)
    sum_neg = jnp.sum(jnp.where(eye, 0.0, l_aa), axis=1, keepdims=True)
    pos_aug = jnp.concatenate(
        [jnp.diagonal(l_aa, B), jnp.diagonal(l_aa, -B)]).reshape(M2, 1)
    pos_near = jnp.concatenate(
        [jnp.diagonal(l_an, k * B) for k in range(-1, m)]).reshape(M2, m)
    lpa = -jnp.log(pos_aug / (sum_neg + eps))
    lpn = -jnp.log(pos_near / (sum_neg + eps))
    mean_lp = (m * lpa + jnp.sum(lpn, axis=1, keepdims=True)) / (2 * m)
    return jnp.sum(mean_lp) / (2 * B)


if __name__ == "__main__":
    def _check(B, D, m, key, **kw):
        k1, k2, k3 = jax.random.split(key, 3)
        z1 = jax.random.normal(k1, (B, D), dtype=jnp.float32)
        z2 = jax.random.normal(k2, (B, D), dtype=jnp.float32)
        zn = jax.random.normal(k3, (m * B, D), dtype=jnp.float32)

        ref_f32 = _reference_loss(z1, z2, zn)
        ref_bf16 = _reference_loss(z1, z2, zn, operand_dtype=jnp.bfloat16)

        loss_f32 = jax.block_until_ready(
            modified_supcon_loss(z1, z2, zn, use_bf16=False, **kw))
        loss_bf16 = jax.block_until_ready(
            modified_supcon_loss(z1, z2, zn, use_bf16=True, **kw))

        assert jnp.isfinite(loss_f32) and jnp.isfinite(loss_bf16)
        # exact-semantics path (f32 MXU operands) vs the literal reference
        assert jnp.allclose(loss_f32, ref_f32, rtol=1e-3, atol=1e-3), (loss_f32, ref_f32)
        # fast path (bf16 MXU operands) vs the bf16-operand reference
        assert jnp.allclose(loss_bf16, ref_bf16, rtol=1e-3, atol=1e-3), (loss_bf16, ref_bf16)
        # bf16 drift relative to the full-f32 reference stays small
        assert jnp.allclose(loss_bf16, ref_f32, rtol=5e-2, atol=5e-2), (loss_bf16, ref_f32)

    key = jax.random.PRNGKey(0)
    ka, kb = jax.random.split(key)
    # tiny shapes implied by the module
    _check(4, 32, 2, ka)
    # non-aligned shapes that exercise the multi-tile grid, padding and all masks
    _check(96, 72, 3, kb, tile_rows=128, tile_cols=128)
    print("KERNEL_OK")
</pallas_src>

<mosaic_0001>
module attributes {stable_mosaic.version = 11 : i64} {
  func.func @_supcon_kernel(%arg0: i32, %arg1: i32, %arg2: memref<16x128xf32, #tpu.memory_space<vmem>>, %arg3: memref<128x128xf32, #tpu.memory_space<vmem>>, %arg4: memref<8x128xf32, #tpu.memory_space<vmem>>, %arg5: memref<16x1xf32, #tpu.memory_space<vmem>>, %arg6: memref<16x1xf32, #tpu.memory_space<vmem>>) attributes {dimension_semantics = [#tpu.dimension_semantics<parallel>, #tpu.dimension_semantics<arbitrary>], iteration_bounds = array<i64: 1, 2>, scalar_prefetch = 0 : i64, scratch_operands = 2 : i64, tpu.core_type = #tpu.core_type<tc>, window_params = [{transform_indices = @transform_0, window_bounds = array<i64: 16, 128>}, {transform_indices = @transform_1, window_bounds = array<i64: 128, 128>}, {transform_indices = @transform_2, window_bounds = array<i64: 8, 128>}]} {
    %c0_i32 = arith.constant 0 : i32
    %0 = arith.cmpi eq, %arg1, %c0_i32 : i32
    %1 = arith.extui %0 : i1 to i32
    %c0_i32_0 = arith.constant 0 : i32
    %2 = arith.cmpi ne, %1, %c0_i32_0 : i32
    scf.if %2 {
      %cst_9 = arith.constant 0.000000e+00 : f32
      %20 = vector.broadcast %cst_9 : f32 to vector<16x1xf32>
      %c0_10 = arith.constant 0 : index
      %c0_11 = arith.constant 0 : index
      %21 = vector.load %arg5[%c0_10, %c0_11] : memref<16x1xf32, #tpu.memory_space<vmem>>, vector<16x1xf32>
      tpu.vector_store %arg5[%c0_10, %c0_11], %20 {strides = array<i32>} : memref<16x1xf32, #tpu.memory_space<vmem>>, vector<16x1xf32>,
      %cst_12 = arith.constant 0.000000e+00 : f32
      %22 = vector.broadcast %cst_12 : f32 to vector<16x1xf32>
      %c0_13 = arith.constant 0 : index
      %c0_14 = arith.constant 0 : index
      %23 = vector.load %arg6[%c0_13, %c0_14] : memref<16x1xf32, #tpu.memory_space<vmem>>, vector<16x1xf32>
      tpu.vector_store %arg6[%c0_13, %c0_14], %22 {strides = array<i32>} : memref<16x1xf32, #tpu.memory_space<vmem>>, vector<16x1xf32>,
    } else {
    }
    %c16_i32 = arith.constant 16 : i32
    %3 = arith.muli %arg0, %c16_i32 : i32
    %4 = tpu.iota {dimensions = array<i32: 0>} : vector<16x1xi32>
    %5 = vector.broadcast %3 : i32 to vector<16x1xi32>
    %6 = arith.addi %5, %4 : vector<16x1xi32>
    %7 = tpu.iota {dimensions = array<i32: 1>} : vector<1x128xi32>
    %c0 = arith.constant 0 : index
    %c0_1 = arith.constant 0 : index
    %8 = vector.load %arg2[%c0, %c0_1] : memref<16x128xf32, #tpu.memory_space<vmem>>, vector<16x128xf32>
    %c0_2 = arith.constant 0 : index
    %c0_3 = arith.constant 0 : index
    %9 = vector.load %arg3[%c0_2, %c0_3] : memref<128x128xf32, #tpu.memory_space<vmem>>, vector<128x128xf32>
    %cst = arith.constant dense<0.000000e+00> : vector<16x128xf32>
    %10 = tpu.matmul %8, %9, %cst {dimension_numbers = #tpu.dot_dimension_numbers<[1], [0], [0], [1], [0, 0, 1, 1], [], []>} : vector<16x128xf32>, vector<128x128xf32>, vector<16x128xf32> -> vector<16x128xf32>
    %c1_i32 = arith.constant 1 : i32
    %11 = arith.cmpi slt, %arg1, %c1_i32 : i32
    %12 = arith.extui %11 : i1 to i32
    %c0_i32_4 = arith.constant 0 : i32
    %13 = arith.cmpi ne, %12, %c0_i32_4 : i32
    scf.if %13 {
      %c128_i32 = arith.constant 128 : i32
      %20 = arith.muli %arg1, %c128_i32 : i32
      %21 = vector.broadcast %20 : i32 to vector<1x128xi32>
      %22 = arith.addi %21, %7 : vector<1x128xi32>
      %c8_i32 = arith.constant 8 : i32
      %23 = vector.broadcast %c8_i32 : i32 to vector<1x128xi32>
      %24 = arith.cmpi slt, %22, %23 : vector<1x128xi32>
      %25 = vector.broadcast %22 : vector<1x128xi32> to vector<16x128xi32>
      %26 = vector.broadcast %6 : vector<16x1xi32> to vector<16x128xi32>
      %27 = arith.cmpi ne, %25, %26 : vector<16x128xi32>
      %cst_9 = arith.constant 14.2857141 : f32
      %28 = vector.broadcast %cst_9 : f32 to vector<16x128xf32>
      %29 = arith.mulf %10, %28 : vector<16x128xf32>
      %30 = math.exp %29 : vector<16x128xf32>
      %c0_10 = arith.constant 0 : index
      %c0_11 = arith.constant 0 : index
      %31 = vector.load %arg5[%c0_10, %c0_11] : memref<16x1xf32, #tpu.memory_space<vmem>>, vector<16x1xf32>
      %32 = vector.broadcast %24 : vector<1x128xi1> to vector<16x128xi1>
      %33 = arith.andi %32, %27 : vector<16x128xi1>
      %cst_12 = arith.constant 0.000000e+00 : f32
      %34 = vector.broadcast %cst_12 : f32 to vector<16x128xf32>
      %35 = arith.select %33, %30, %34 : vector<16x128xi1>, vector<16x128xf32>
      %cst_13 = arith.constant dense<0.000000e+00> : vector<16xf32>
      %36 = vector.multi_reduction <add>, %35, %cst_13 [1] : vector<16x128xf32> to vector<16xf32>
      %37 = vector.shape_cast %36 : vector<16xf32> to vector<16x1xf32>
      %38 = arith.addf %31, %37 : vector<16x1xf32>
      %c0_14 = arith.constant 0 : index
      %c0_15 = arith.constant 0 : index
      %39 = vector.load %arg5[%c0_14, %c0_15] : memref<16x1xf32, #tpu.memory_space<vmem>>, vector<16x1xf32>
      tpu.vector_store %arg5[%c0_14, %c0_15], %38 {strides = array<i32>} : memref<16x1xf32, #tpu.memory_space<vmem>>, vector<16x1xf32>,
      %c4_i32 = arith.constant 4 : i32
      %40 = vector.broadcast %c4_i32 : i32 to vector<16x1xi32>
      %41 = arith.cmpi slt, %6, %40 : vector<16x1xi32>
      %c4_i32_16 = arith.constant 4 : i32
      %42 = vector.broadcast %c4_i32_16 : i32 to vector<16x1xi32>
      %43 = arith.addi %6, %42 : vector<16x1xi32>
      %c4_i32_17 = arith.constant 4 : i32
      %44 = vector.broadcast %c4_i32_17 : i32 to vector<16x1xi32>
      %45 = arith.subi %6, %44 : vector<16x1xi32>
      %46 = arith.select %41, %43, %45 : vector<16x1xi1>, vector<16x1xi32>
      %c0_18 = arith.constant 0 : index
      %c0_19 = arith.constant 0 : index
      %47 = vector.load %arg6[%c0_18, %c0_19] : memref<16x1xf32, #tpu.memory_space<vmem>>, vector<16x1xf32>
      %48 = vector.broadcast %22 : vector<1x128xi32> to vector<16x128xi32>
      %49 = vector.broadcast %46 : vector<16x1xi32> to vector<16x128xi32>
      %50 = arith.cmpi eq, %48, %49 : vector<16x128xi32>
      %cst_20 = arith.constant 0.000000e+00 : f32
      %51 = vector.broadcast %cst_20 : f32 to vector<16x128xf32>
      %52 = arith.select %50, %10, %51 : vector<16x128xi1>, vector<16x128xf32>
      %cst_21 = arith.constant dense<0.000000e+00> : vector<16xf32>
      %53 = vector.multi_reduction <add>, %52, %cst_21 [1] : vector<16x128xf32> to vector<16xf32>
      %54 = vector.shape_cast %53 : vector<16xf32> to vector<16x1xf32>
      %cst_22 = arith.constant 2.000000e+00 : f32
      %55 = vector.broadcast %cst_22 : f32 to vector<16x1xf32>
      %56 = arith.mulf %55, %54 : vector<16x1xf32>
      %57 = arith.addf %47, %56 : vector<16x1xf32>
      %c0_23 = arith.constant 0 : index
      %c0_24 = arith.constant 0 : index
      %58 = vector.load %arg6[%c0_23, %c0_24] : memref<16x1xf32, #tpu.memory_space<vmem>>, vector<16x1xf32>
      tpu.vector_store %arg6[%c0_23, %c0_24], %57 {strides = array<i32>} : memref<16x1xf32, #tpu.memory_space<vmem>>, vector<16x1xf32>,
    } else {
    }
    %c1_i32_5 = arith.constant 1 : i32
    %14 = arith.cmpi sge, %arg1, %c1_i32_5 : i32
    %15 = arith.extui %14 : i1 to i32
    %c0_i32_6 = arith.constant 0 : i32
    %16 = arith.cmpi ne, %15, %c0_i32_6 : i32
    scf.if %16 {
      %cst_9 = arith.constant 1.000000e+00 : f32
      %20 = vector.broadcast %cst_9 : f32 to vector<16x128xf32>
      %21 = arith.minimumf %10, %20 : vector<16x128xf32>
      %c1_i32_10 = arith.constant 1 : i32
      %22 = arith.subi %arg1, %c1_i32_10 : i32
      %c128_i32 = arith.constant 128 : i32
      %23 = arith.muli %22, %c128_i32 : i32
      %24 = vector.broadcast %23 : i32 to vector<1x128xi32>
      %25 = arith.addi %24, %7 : vector<1x128xi32>
      %c8_i32 = arith.constant 8 : i32
      %26 = vector.broadcast %c8_i32 : i32 to vector<1x128xi32>
      %27 = arith.cmpi slt, %25, %26 : vector<1x128xi32>
      %c4_i32 = arith.constant 4 : i32
      %28 = vector.broadcast %c4_i32 : i32 to vector<16x1xi32>
      %29 = arith.cmpi slt, %6, %28 : vector<16x1xi32>
      %c4_i32_11 = arith.constant 4 : i32
      %30 = vector.broadcast %c4_i32_11 : i32 to vector<16x1xi32>
      %31 = arith.subi %6, %30 : vector<16x1xi32>
      %32 = arith.select %29, %6, %31 : vector<16x1xi1>, vector<16x1xi32>
      %c4_i32_12 = arith.constant 4 : i32
      %c0_i32_13 = arith.constant 0 : i32
      %33 = arith.cmpi eq, %c4_i32_12, %c0_i32_13 : i32
      %c1_i32_14 = arith.constant 1 : i32
      %34 = arith.select %33, %c1_i32_14, %c4_i32_12 : i32
      %35 = vector.broadcast %34 : i32 to vector<1x128xi32>
      %36 = arith.remsi %25, %35 : vector<1x128xi32>
      %c0_i32_15 = arith.constant 0 : i32
      %37 = vector.broadcast %c0_i32_15 : i32 to vector<1x128xi32>
      %38 = arith.cmpi ne, %36, %37 : vector<1x128xi32>
      %c0_i32_16 = arith.constant 0 : i32
      %39 = vector.broadcast %c0_i32_16 : i32 to vector<1x128xi32>
      %40 = arith.cmpi slt, %36, %39 : vector<1x128xi32>
      %c0_i32_17 = arith.constant 0 : i32
      %41 = arith.cmpi slt, %34, %c0_i32_17 : i32
      %42 = vector.broadcast %41 : i1 to vector<1x128xi1>
      %43 = vector.broadcast %42 : vector<1x128xi1> to vector<1x128xi1>
      %44 = arith.xori %40, %43 : vector<1x128xi1>
      %45 = arith.andi %44, %38 : vector<1x128xi1>
      %46 = vector.broadcast %34 : i32 to vector<1x128xi32>
      %47 = arith.addi %36, %46 : vector<1x128xi32>
      %48 = arith.select %45, %47, %36 : vector<1x128xi1>, vector<1x128xi32>
      %49 = vector.broadcast %48 : vector<1x128xi32> to vector<16x128xi32>
      %50 = vector.broadcast %32 : vector<16x1xi32> to vector<16x128xi32>
      %51 = arith.cmpi eq, %49, %50 : vector<16x128xi32>
      %52 = vector.broadcast %27 : vector<1x128xi1> to vector<16x128xi1>
      %53 = arith.andi %52, %51 : vector<16x128xi1>
      %c0_18 = arith.constant 0 : index
      %c0_19 = arith.constant 0 : index
      %54 = vector.load %arg6[%c0_18, %c0_19] : memref<16x1xf32, #tpu.memory_space<vmem>>, vector<16x1xf32>
      %cst_20 = arith.constant 0.000000e+00 : f32
      %55 = vector.broadcast %cst_20 : f32 to vector<16x128xf32>
      %56 = arith.select %53, %21, %55 : vector<16x128xi1>, vector<16x128xf32>
      %cst_21 = arith.constant dense<0.000000e+00> : vector<16xf32>
      %57 = vector.multi_reduction <add>, %56, %cst_21 [1] : vector<16x128xf32> to vector<16xf32>
      %58 = vector.shape_cast %57 : vector<16xf32> to vector<16x1xf32>
      %59 = arith.addf %54, %58 : vector<16x1xf32>
      %c0_22 = arith.constant 0 : index
      %c0_23 = arith.constant 0 : index
      %60 = vector.load %arg6[%c0_22, %c0_23] : memref<16x1xf32, #tpu.memory_space<vmem>>, vector<16x1xf32>
      tpu.vector_store %arg6[%c0_22, %c0_23], %59 {strides = array<i32>} : memref<16x1xf32, #tpu.memory_space<vmem>>, vector<16x1xf32>,
    } else {
    }
    %c1_i32_7 = arith.constant 1 : i32
    %17 = arith.cmpi eq, %arg1, %c1_i32_7 : i32
    %18 = arith.extui %17 : i1 to i32
    %c0_i32_8 = arith.constant 0 : i32
    %19 = arith.cmpi ne, %18, %c0_i32_8 : i32
    scf.if %19 {
      %c8_i32 = arith.constant 8 : i32
      %20 = vector.broadcast %c8_i32 : i32 to vector<16x1xi32>
      %21 = arith.cmpi slt, %6, %20 : vector<16x1xi32>
      %c0_9 = arith.constant 0 : index
      %c0_10 = arith.constant 0 : index
      %22 = vector.load %arg5[%c0_9, %c0_10] : memref<16x1xf32, #tpu.memory_space<vmem>>, vector<16x1xf32>
      %cst_11 = arith.constant 9.99999997E-7 : f32
      %23 = vector.broadcast %cst_11 : f32 to vector<16x1xf32>
      %24 = arith.addf %22, %23 : vector<16x1xf32>
      %25 = math.log %24 : vector<16x1xf32>
      %cst_12 = arith.constant 4.000000e+00 : f32
      %26 = vector.broadcast %cst_12 : f32 to vector<16x1xf32>
      %27 = arith.mulf %26, %25 : vector<16x1xf32>
      %c0_13 = arith.constant 0 : index
      %c0_14 = arith.constant 0 : index
      %28 = vector.load %arg6[%c0_13, %c0_14] : memref<16x1xf32, #tpu.memory_space<vmem>>, vector<16x1xf32>
      %cst_15 = arith.constant 14.2857141 : f32
      %29 = vector.broadcast %cst_15 : f32 to vector<16x1xf32>
      %30 = arith.mulf %29, %28 : vector<16x1xf32>
      %31 = arith.subf %27, %30 : vector<16x1xf32>
      %cst_16 = arith.constant 0.000000e+00 : f32
      %32 = vector.broadcast %cst_16 : f32 to vector<16x1xf32>
      %33 = arith.select %21, %31, %32 : vector<16x1xi1>, vector<16x1xf32>
      %34 = vector.shape_cast %33 : vector<16x1xf32> to vector<1x16x1xf32>
      %cst_17 = arith.constant dense<0.000000e+00> : vector<1xf32>
      %35 = vector.multi_reduction <add>, %34, %cst_17 [1, 2] : vector<1x16x1xf32> to vector<1xf32>
      %36 = vector.shape_cast %35 : vector<1xf32> to vector<1x1x1xf32>
      %37 = vector.extract %36[0, 0, 0] : f32 from vector<1x1x1xf32>
      %cst_18 = arith.constant 3.125000e-02 : f32
      %38 = arith.mulf %37, %cst_18 : f32
      %39 = vector.broadcast %38 : f32 to vector<8x128xf32>
      %c0_19 = arith.constant 0 : index
      %c0_20 = arith.constant 0 : index
      %40 = vector.load %arg4[%c0_19, %c0_20] : memref<8x128xf32, #tpu.memory_space<vmem>>, vector<8x128xf32>
      tpu.vector_store %arg4[%c0_19, %c0_20], %39 {strides = array<i32>} : memref<8x128xf32, #tpu.memory_space<vmem>>, vector<8x128xf32>,
    } else {
    }
    return
  }
  func.func @transform_0(%arg0: i32, %arg1: i32) -> (i32, i32) {
    %c0_i32 = arith.constant 0 : i32
    %c0_i32_0 = arith.constant 0 : i32
    return %arg0, %c0_i32 : i32, i32
  }
  func.func @transform_1(%arg0: i32, %arg1: i32) -> (i32, i32) {
    %c0_i32 = arith.constant 0 : i32
    %c0_i32_0 = arith.constant 0 : i32
    return %c0_i32, %arg1 : i32, i32
  }
  func.func @transform_2(%arg0: i32, %arg1: i32) -> (i32, i32) {
    %c0_i32 = arith.constant 0 : i32
    %c0_i32_0 = arith.constant 0 : i32
    return %arg0, %c0_i32 : i32, i32
  }
}

</mosaic_0001>

<bundles_post_ra>
// kernel: tpu_custom_call.1
= control target key start
LH: loop header
LB: loop body
LE: loop exit
PB: predicated region body
PF: predicated region fallthrough
CT: control target
= control target key end

     0   :  { %7 = vsyncpa [#allocation5], 0  ;;  %s951_s0 = inlined_call_operand.hbm [shape: f32[16,128], index: 0, kind: input, shape index: {}]   ;;  %s952_s1 = inlined_call_operand.hbm [shape: f32[128,256], index: 1, kind: input, shape index: {}]   ;;  %s953_s2 = inlined_call_operand.hbm [shape: f32[8,128], index: 2, kind: output, shape index: {}]  }
   0x1   :  { %8 = vsyncpa [#allocation8], 0 }
   0x2   :  { %10 = vsyncpa [#allocation8 + $0x1], 0 }
   0x3   :  { %11 = vsyncpa [#allocation6], 0  ;;  %s778_s9 = smov 0   ;;  %s780_s10 = smov 0  }
   0x4   :  { %s782_s11 = smov 0   ;;  %s784_s12 = smov 0  }
   0x5   :  { %s786_s13 = smov 0   ;;  %s788_s14 = smov 0  }
   0x6 LB: > { %s484_s15 = sadd.s32 4294967295, %s755_s14   ;;  %p75_p0 = scmp.ne.s32.totalorder %s739_s10, %s735_s9  ;;  %s755_s14 = sphi %s788_s14, %s17_s14   ;;  %s751_s13 = sphi %s786_s13, %s962_s13   ;;  %s747_s12 = sphi %s784_s12, %s961_s12   ;;  %s743_s11 = sphi %s782_s11, %s960_s11   ;;  %s739_s10 = sphi %s780_s10, %s959_s10   ;;  %s735_s9 = sphi %s778_s9, %s958_s9  }
   0x7   : > { %p810_p1 = scmp.eq.s32.totalorder %s484_s15, 0  ;;  %p485_p2 = scmp.ge.s32.totalorder %s755_s14, 1 }
   0x8   : > { %p112_p3 = scmp.lt.s32.totalorder %s755_s14, 3  ;;  %s126_s20 = sshll.u32 %s951_s0, 4  ;;  %s127_s20 = int_to_ptr.hbm [resolvable:$true] %s126_s20 }
   0x9   : > { %p818_p4 = por %p810_p1, %p75_p0  ;;  %s757_s22 = smov [#allocation4]  }
   0xa   : > { %p825_p5 = pnand %p485_p2, %p112_p3  ;;  %s128_s23 = sshll.u32 %s757_s22, 4  ;;  %s129_s23 = int_to_ptr.vmem [resolvable:$true] %s128_s23 }
   0xb   : > { %s758_s24 = smov 128   ;;  %s759_s25 = smov 8  }
   0xc   : > { %p536_p6 = pneg %p825_p5  ;;  %s26_s26 = sadd.s32 1, %s751_s13 }
   0xd   : > { %p27_p8 = scmp.ge.s32.totalorder %s26_s26, 2  ;;  %s62_s27 = sadd.s32 1, %s743_s11 }
   0xe   : > { %p537_p7 = pnand %p536_p6, %p810_p1  ;;  %p69_p9 = scmp.ne.s32.totalorder %s743_s11, %s739_s10 }
   0xf   : > { %p70_p10 = scmp.eq.s32.totalorder %s755_s14, 0  ;;  %s964_s26 = smov (%p27_p8, %s26_s26), 0 }
  0x10   : > { %539 = dma.hbm_to_vmem [thread:$0]  (!%p537_p7), %s127_s20, 256, %s129_s23, [#allocation5], %s758_s24, %s758_s24, %s759_s25  }
  0x11   : > { %p843_p11 = por %p70_p10, %p69_p9  ;;  %p545_p12 = scmp.lt.s32.totalorder %s755_s14, 2 }
  0x12   : > { %s59_s29 = ssub.s32 %s751_s13, %s964_s26  ;;  %s142_s30 = sand.u32 1, %s743_s11  }
  0x13   : > { %p60_p13 = scmp.eq.s32.totalorder %s59_s29, 0  ;;  %s488_s3 = sshll.u32 %s142_s30, 7 }
  0x14   : > { %s489_s4 = sshll.u32 %s751_s13, 3  ;;  %s146_s18 = scalar_lea.vmem [#allocation7], %s488_s3 }
  0x15   : > { %s853_s5 = scalar_select %p60_p13, %s743_s11, %s62_s27  }
  0x16   : > { %s150_s8 = scalar_lea.hbm %s952_s1, %s489_s4  ;;  %s153_s19 = sshll.u32 %s146_s18, 4  ;;  %s154_s19 = int_to_ptr.vmem [resolvable:$true] %s153_s19 }
  0x17   : > { %s151_s9 = sshll.u32 %s150_s8, 4  ;;  %p541_p0 = pnand %p545_p12, %p843_p11  ;;  %s152_s9 = int_to_ptr.hbm [resolvable:$true] %s151_s9 }
  0x18   : > { %s143_s20 = scalar_lea.sflag [#allocation8], %s142_s30  ;;  %s760_s22 = smov 256  }
  0x19   : > { %543 = dma.hbm_to_vmem [thread:$0]  (!%p541_p0), %s152_s9, 2048, %s154_s19, %s143_s20, %s760_s22, %s758_s24, %s759_s25  }
  0x1a   : > { %165 = sbr.rel (%p825_p5) target bundleno = 708 (0x2c4), region = 28 }
  0x1f   : > { %722 = dma.done.wait (%p810_p1), [#allocation5], 256  }
  0x20   : > { %724 = vsyncadd (%p810_p1), [#allocation5], 4294967040  ;;  %s172_s23 = sand.u32 1, %s739_s10  }
  0x21   : > { %s492_s27 = sshll.u32 %s172_s23, 7  ;;  %s173_s28 = scalar_lea.sflag [#allocation8], %s172_s23 }
  0x22   : > { %s871_s29 = scalar_lea.vmem [#allocation7], %s492_s27 }
  0x23   : > { %726 = dma.done.wait (%p818_p4), %s173_s28, 2048  }
  0x24   : > { %728 = vsyncadd (%p818_p4), %s173_s28, 4294965248  ;;  %p493_p2 = scmp.ne.s32.totalorder %s747_s12, 0 }
  0x26   : > { %197 = sbr.rel (%p493_p2) target bundleno = 48 (0x30), region = 40 }
  0x2b   : > { %vm198_vm0 = vcmask 7168   ;;  %v761_v0 = vmov 0.0  }
  0x2c   : > { %199 = vst.msk [vmem:[#allocation2] sm:$0xff] %vm198_vm0, %v761_v0 }
  0x2d   : > { %200 = vst.msk [vmem:[#allocation2 + $0x8] sm:$0xff] %vm198_vm0, %v761_v0 }
  0x2e   : > { %201 = vst.msk [vmem:[#allocation3] sm:$0xff] %vm198_vm0, %v761_v0 }
  0x2f   : > { %202 = vst.msk [vmem:[#allocation3 + $0x8] sm:$0xff] %vm198_vm0, %v761_v0 }
  0x30 PF: > { %v204_v1 = vlaneseq  ;;  %v229_v2 = vld [vmem:[%s871_s29 + $0x78] sm:$0xff]  ;;  %v228_v3 = vld [vmem:[%s871_s29 + $0x70] sm:$0xff]  ;;  %v227_v6 = vld [vmem:[%s871_s29 + $0x68] sm:$0xff]  ;;  %p494_p1 = scmp.ge.s32.totalorder %s747_s12, 1 }
  0x31   : > { %230 = vmatpush.msra.mxu0 %v229_v2  ;;  %508 = vmatpush.msra.mxu1 %v229_v2  ;;  %v226_v8 = vld [vmem:[%s871_s29 + $0x60] sm:$0xff]  ;;  %v225_v9 = vld [vmem:[%s871_s29 + $0x58] sm:$0xff]  ;;  %v224_v10 = vld [vmem:[%s871_s29 + $0x50] sm:$0xff]  ;;  %s495_s16 = sshll.u32 (!%p494_p1), %s747_s12, 7 }
  0x32   : > { %v880_v4 = vshrl.u32 %v204_v1, 7  ;;  %v882_v5 = vand.u32 127, %v204_v1  ;;  %v223_v11 = vld [vmem:[%s871_s29 + $0x48] sm:$0xff]  ;;  %v222_v12 = vld [vmem:[%s871_s29 + $0x40] sm:$0xff]  ;;  %v221_v13 = vld [vmem:[%s871_s29 + $0x38] sm:$0xff] }
  0x33   : > { %231 = vmatpush.msra.mxu0 %v228_v3  ;;  %509 = vmatpush.msra.mxu1 %v228_v3  ;;  %v220_v14 = vld [vmem:[%s871_s29 + $0x30] sm:$0xff]  ;;  %v219_v15 = vld [vmem:[%s871_s29 + $0x28] sm:$0xff]  ;;  %v218_v16 = vld [vmem:[%s871_s29 + $0x20] sm:$0xff] }
  0x34   : > { %v886_v7 = vadd.s32 8, %v880_v4  ;;  %v217_v17 = vld [vmem:[%s871_s29 + $0x18] sm:$0xff]  ;;  %v216_v18 = vld [vmem:[%s871_s29 + $0x10] sm:$0xff]  ;;  %v215_v19 = vld [vmem:[%s871_s29 + $0x8] sm:$0xff] }
  0x35   : > { %232 = vmatpush.msra.mxu0 %v227_v6  ;;  %510 = vmatpush.msra.mxu1 %v227_v6  ;;  %v214_v20 = vld [vmem:[%s871_s29] sm:$0xff]  ;;  %v212_v21 = vld [vmem:[#allocation4] sm:$0xff]  ;;  %v213_v22 = vld [vmem:[#allocation4 + $0x8] sm:$0xff] }
  0x37   : > { %233 = vmatpush.msra.mxu0 %v226_v8  ;;  %511 = vmatpush.msra.mxu1 %v226_v8 }
  0x39   : > { %234 = vmatpush.msra.mxu0 %v225_v9  ;;  %512 = vmatpush.msra.mxu1 %v225_v9 }
  0x3b   : > { %235 = vmatpush.msra.mxu0 %v224_v10  ;;  %513 = vmatpush.msra.mxu1 %v224_v10 }
  0x3d   : > { %236 = vmatpush.msra.mxu0 %v223_v11  ;;  %514 = vmatpush.msra.mxu1 %v223_v11 }
  0x3f   : > { %237 = vmatpush.msra.mxu0 %v222_v12  ;;  %515 = vmatpush.msra.mxu1 %v222_v12 }
  0x41   : > { %238 = vmatpush.msra.mxu0 %v221_v13  ;;  %516 = vmatpush.msra.mxu1 %v221_v13 }
  0x43   : > { %239 = vmatpush.msra.mxu0 %v220_v14  ;;  %517 = vmatpush.msra.mxu1 %v220_v14 }
  0x45   : > { %240 = vmatpush.msra.mxu0 %v219_v15  ;;  %518 = vmatpush.msra.mxu1 %v219_v15 }
  0x47   : > { %241 = vmatpush.msra.mxu0 %v218_v16  ;;  %519 = vmatpush.msra.mxu1 %v218_v16 }
  0x49   : > { %242 = vmatpush.msra.mxu0 %v217_v17  ;;  %520 = vmatpush.msra.mxu1 %v217_v17 }
  0x4b   : > { %243 = vmatpush.msra.mxu0 %v216_v18  ;;  %521 = vmatpush.msra.mxu1 %v216_v18 }
  0x4d   : > { %244 = vmatpush.msra.mxu0 %v215_v19  ;;  %522 = vmatpush.msra.mxu1 %v215_v19 }
  0x4f   : > { %245 = vmatpush.msra.mxu0 %v214_v20  ;;  %523 = vmatpush.msra.mxu1 %v214_v20 }
  0x50   : > { %246 = vmatmul.f32.vlgmr.msra.gmra.mxu0 %v212_v21  ;;  %249 = vmatmul.f32.vlgmr.msra.gmra.mxu1 %v213_v22 }
  0xc9   : > { %256 = sbr.rel (%p494_p1) target bundleno = 345 (0x159), region = 44 }
  0xcd   : > { %v901_v23 = vpop.f32.mrf.mxu0  ;;  %v903_v24 = vpop.f32.mrf.mxu1 }
  0xce   : > { %vm286_vm1 = vcmp.lt.s32.totalorder %v880_v4, 4  ;;  %v288_v25 = vadd.s32 4, %v880_v4  ;;  %v496_v26 = vadd.s32 4294967292, %v880_v4  ;;  %v263_v27 = vmul.f32 14.285714, %v901_v23  ;;  %v294_v41 = vld [vmem:[#allocation3] sm:$0xff] }
  0xcf   : > { %v258_v28 = vstv %s495_s16  ;;  %v264_v29 = vmul.f32 14.285714, %v903_v24  ;;  %v497_v33 = vadd.s32 4294967292, %v886_v7  ;;  %vm283_vm9 = vcmask 7168   ;;  %v269_v45 = vld [vmem:[#allocation2] sm:$0xff]  ;;  %v295_v48 = vld [vmem:[#allocation3 + $0x8] sm:$0xff] }
  0xd0   : > { %v259_v30 = vadd.s32 %v258_v28, %v882_v5  ;;  %v292_v31 = vsel %vm286_vm1, %v288_v25, %v496_v26  ;;  %v265_v32 = vmul.f32 1.442695, %v263_v27  ;;  %v270_v52 = vld [vmem:[#allocation2 + $0x8] sm:$0xff] }
  0xd1   : > { %v267_v34 = vmul.f32 1.442695, %v264_v29 }
  0xd2   : > { %vm296_vm2 = vcmp.eq.s32.totalorder %v259_v30, %v292_v31  ;;  %603 = vpow2.f32 %v265_v32  ;;  %vm260_vm3 = vcmp.lt.s32.totalorder %v259_v30, 8  ;;  %vm261_vm4 = vcmp.ne.s32.totalorder %v259_v30, %v880_v4 }
  0xd3   : > { %v298_v35 = vsel %vm296_vm2, %v901_v23, 0.0  ;;  %vm273_vm5 = vmand %vm260_vm3, %vm261_vm4  ;;  %vm297_vm6 = vcmp.eq.s32.totalorder %v259_v30, %v497_v33  ;;  %605 = vpow2.f32 %v267_v34  ;;  %vm262_vm7 = vcmp.ne.s32.totalorder %v259_v30, %v886_v7 }
  0xd4   : > { %300 = vadd.xlane.f32.xlu0 %v298_v35  ;;  %v299_v38 = vsel %vm297_vm6, %v903_v24, 0.0  ;;  %vm274_vm8 = vmand %vm260_vm3, %vm262_vm7 }
  0xd8   : > { %v604_v36 = vpop.eup %603 }
  0xd9   : > { %v275_v37 = vsel %vm273_vm5, %v604_v36, 0.0  ;;  %v606_v39 = vpop.eup %605 }
  0xda   : > { %277 = vadd.xlane.f32.xlu1 %v275_v37  ;;  %v276_v40 = vsel %vm274_vm8, %v606_v39, 0.0 }
  0xdc   : > { %302 = vadd.xlane.f32.xlu0 %v299_v38 }
  0xe2   : > { %279 = vadd.xlane.f32.xlu1 %v276_v40 }
 0x147   : > { %v301_v42 = vpop.xlane.xlu0 %300 }
 0x148   : > { %v304_v43 = vmul.f32 2.0, %v301_v42 }
 0x14a   : > { %v306_v44 = vadd.f32 %v304_v43, %v294_v41 }
 0x14c   : > { %308 = vst.msk [vmem:[#allocation3] sm:$0xff] %vm283_vm9, %v306_v44 }
 0x14d   : > { %v278_v46 = vpop.xlane.xlu1 %277 }
 0x14e   : > { %v281_v47 = vadd.f32 %v278_v46, %v269_v45 }
 0x14f   : > { %v303_v49 = vpop.xlane.xlu0 %302 }
 0x150   : > { %284 = vst.msk [vmem:[#allocation2] sm:$0xff] %vm283_vm9, %v281_v47  ;;  %v305_v50 = vmul.f32 2.0, %v303_v49 }
 0x152   : > { %v307_v51 = vadd.f32 %v305_v50, %v295_v48 }
 0x154   : > { %309 = vst.msk [vmem:[#allocation3 + $0x8] sm:$0xff] %vm283_vm9, %v307_v51 }
 0x155   : > { %v280_v53 = vpop.xlane.xlu1 %279 }
 0x156   : > { %v282_v54 = vadd.f32 %v280_v53, %v270_v52 }
 0x158   : > { %285 = vst.msk [vmem:[#allocation2 + $0x8] sm:$0xff] %vm283_vm9, %v282_v54 }
 0x159 PF: > { %p498_p3 = scmp.lt.s32.totalorder %s747_s12, 1 }
 0x15a   : > { %s499_s17 = sadd.s32 (!%p498_p3), 4294967295, %s747_s12 }
 0x15b   : > { %313 = sbr.rel (%p498_p3) target bundleno = 496 (0x1f0), region = 48  ;;  %s500_s21 = sshll.u32 (!%p498_p3), %s499_s17, 7 }
 0x160   : > { %v318_v55 = vstv %s500_s21  ;;  %v501_v60 = vadd.s32 4294967292, %v880_v4  ;;  %vm321_vm11 = vcmp.lt.s32.totalorder %v880_v4, 4  ;;  %v314_v1 = vmin.f32 %v901_v23, 1.0  ;;  %v346_v11 = vld [vmem:[#allocation3 + $0x8] sm:$0xff] }
 0x161   : > { %v319_v56 = vadd.s32 %v318_v55, %v882_v5  ;;  %v502_v2 = vadd.s32 4294967292, %v886_v7  ;;  %v315_v6 = vmin.f32 %v903_v24, 1.0  ;;  %vm355_vm4 = vcmask 7168  }
 0x162   : > { %v325_v63 = vsel %vm321_vm11, %v880_v4, %v501_v60  ;;  %v345_v4 = vld [vmem:[#allocation3] sm:$0xff] }
 0x163   : > { %vm327_vm10 = vcmp.lt.s32.totalorder %v319_v56, 0  ;;  %v328_v57 = vsub.s32 0, %v319_v56  ;;  %vm320_vm14 = vcmp.lt.s32.totalorder %v319_v56, 8 }
 0x165   : > { %v329_v58 = vsel %vm327_vm10, %v328_v57, %v319_v56 }
 0x166   : > { %v331_v59 = vand.u32 3, %v329_v58 }
 0x168   : > { %v332_v61 = vsub.s32 0, %v331_v59 }
 0x16a   : > { %v333_v62 = vsel %vm327_vm10, %v332_v61, %v331_v59 }
 0x16b   : > { %vm334_vm12 = vcmp.ne.s32.totalorder %v333_v62, 0  ;;  %vm335_vm13 = vcmp.lt.s32.totalorder %v333_v62, 0  ;;  %v337_v0 = vadd.s32 4, %v333_v62 }
 0x16c   : > { %vm336_vm15 = vmand %vm335_vm13, %vm334_vm12 }
 0x16d   : > { %v338_v3 = vsel %vm336_vm15, %v337_v0, %v333_v62 }
 0x16e   : > { %vm339_vm0 = vcmp.eq.s32.totalorder %v338_v3, %v325_v63  ;;  %vm340_vm2 = vcmp.eq.s32.totalorder %v338_v3, %v502_v2 }
 0x16f   : > { %vm343_vm1 = vmand %vm320_vm14, %vm339_vm0 }
 0x170   : > { %v347_v5 = vsel %vm343_vm1, %v314_v1, 0.0  ;;  %vm344_vm3 = vmand %vm320_vm14, %vm340_vm2 }
 0x171   : > { %349 = vadd.xlane.f32.xlu0 %v347_v5  ;;  %v348_v8 = vsel %vm344_vm3, %v315_v6, 0.0 }
 0x179   : > { %351 = vadd.xlane.f32.xlu0 %v348_v8 }
 0x1e4   : > { %v350_v9 = vpop.xlane.xlu0 %349 }
 0x1e5   : > { %v353_v10 = vadd.f32 %v350_v9, %v345_v4 }
 0x1e7   : > { %356 = vst.msk [vmem:[#allocation3] sm:$0xff] %vm355_vm4, %v353_v10 }
 0x1ec   : > { %v352_v12 = vpop.xlane.xlu0 %351 }
 0x1ed   : > { %v354_v13 = vadd.f32 %v352_v12, %v346_v11 }
 0x1ef   : > { %357 = vst.msk [vmem:[#allocation3 + $0x8] sm:$0xff] %vm355_vm4, %v354_v13 }
 0x1f0 PF: > { %p503_p4 = scmp.ne.s32.totalorder %s747_s12, 1 }
 0x1f2   : > { %361 = sbr.rel (%p503_p4) target bundleno = 702 (0x2be), region = 52 }
 0x1f7   : > { %v364_v7 = vld [vmem:[#allocation2] sm:$0xff]  ;;  %v374_v15 = vld [vmem:[#allocation3] sm:$0xff]  ;;  %vm382_vm5 = vcmask 7168  }
 0x1f8   : > { %v366_v14 = vadd.f32 1e-06, %v364_v7  ;;  %v376_v18 = vmul.f32 14.285714, %v374_v15 }
 0x1fa   : > { %607 = vlog2.f32 %v366_v14 }
 0x200   : > { %v608_v16 = vpop.eup %607 }
 0x201   : > { %v369_v17 = vmul.f32 0.6931472, %v608_v16 }
 0x203   : > { %v372_v19 = vmul.f32 4.0, %v369_v17 }
 0x205   : > { %v378_v20 = vsub.f32 %v372_v19, %v376_v18 }
 0x207   : > { %v383_v21 = vsel %vm382_vm5, %v378_v20, 0.0 }
 0x208   : > { %386 = vadd.xlane.f32.xlu0 %v383_v21 }
 0x27b   : > { %v387_v22 = vpop.xlane.xlu0 %386 }
 0x27c   : > { %v388_v23 = vrot.slane %v387_v22, 4 }
 0x27e   : > { %v389_v24 = vadd.f32 %v388_v23, %v387_v22 }
 0x280   : > { %v390_v25 = vrot.slane %v389_v24, 2 }
 0x282   : > { %v391_v26 = vadd.f32 %v390_v25, %v389_v24 }
 0x284   : > { %v392_v27 = vrot.slane %v391_v26, 1 }
 0x286   : > { %v393_v28 = vadd.f32 %v392_v27, %v391_v26 }
 0x288   : > { %524 = vpush %v393_v28 }
 0x2b9   : > { %s525_s12 = spop %524 }
 0x2ba   : > { %s395_s24 = smul.f32 0.03125, %s525_s12 }
 0x2bc   : > { %v396_v29 = vstv %s395_s24 }
 0x2bd   : > { %397 = vst [vmem:[#allocation9] sm:$0xff] %v396_v29 }
 0x2be PF: > { %p547_p5 = scmp.eq.s32.totalorder %s484_s15, 1  ;;  %s408_s3 = sshll.u32 %s953_s2, 4  ;;  %s409_s3 = int_to_ptr.hbm [resolvable:$true] %s408_s3 }
 0x2bf   : > { %s762_s4 = smov [#allocation9]  }
 0x2c0   : > { %s406_s6 = sshll.u32 %s762_s4, 4  ;;  %s407_s6 = int_to_ptr.vmem [resolvable:$true] %s406_s6 }
 0x2c1   : > { %533 = dma.vmem_to_hbm [thread:$0]  (%p547_p5), %s407_s6, 128, %s409_s3, [#allocation6]  }
 0x2c2   : > { %730 = dma.done.wait (%p547_p5), [#allocation6], 128  }
 0x2c3   : > { %732 = vsyncadd (%p547_p5), [#allocation6], 4294967168 }
 0x2c4 PF: > { %s17_s14 = sadd.s32 1, %s755_s14   ;;  %s958_s9 = smov %s739_s10 }
 0x2c5   : > { %p14_p6 = scmp.ge.s32.totalorder %s17_s14, 4   ;;  %s959_s10 = smov %s743_s11 }
 0x2c6   : > { %s960_s11 = smov %s853_s5  ;;  %s961_s12 = smov %s751_s13 }
 0x2c7   : > { %s962_s13 = smov %s964_s26  ;;  %16 = sbr.rel (!%p14_p6) target bundleno = 6 (0x6), region = 88 }
 0x2cc   :  { %422 = vsyncpa [#allocation5], 1 }
 0x2cd   :  { %424 = vsyncpa [#allocation5 + $0x1], 1 }
 0x2ce   :  { %425 = vsyncpa [#allocation8], 1 }
 0x2cf   :  { %427 = vsyncpa [#allocation8 + $0x1], 1 }
 0x2d0   :  { %428 = vsyncpa [#allocation6], 1 }
 0x2d1   :  { %430 = vsyncpa [#allocation6 + $0x1], 1 }

</bundles_post_ra>
